<compile_context>
chip_gen: v7x
topology: tpu7x:2x2x1
jax: 0.10.0
libtpu: 0.0.40
codegen_flags: <defaults>
</compile_context>

<pallas_src>
import functools
import math

import jax
import jax.numpy as jnp
import numpy as np
from jax.experimental import pallas as pl
from jax.experimental.pallas import tpu as pltpu


# ----------------------------------------------------------------------------
# Fused Pallas kernel: whole affineSteps.forward, 5 MXU matmuls total
# ----------------------------------------------------------------------------
def affine_steps_kernel(x_ref, wup_ref, wfc_ref, wdn_ref, b_ref, out_ref,
                        *, k, last_seg_start, ld_col, compute_dtype):
    n_pad = out_ref.shape[-1]                       # padded feature width (>=128)
    x = x_ref[...]                                  # (bs, n_pad) float32

    # Stacked up-projection for every branch of every step (one matmul).
    h = jnp.dot(x.astype(compute_dtype), wup_ref[...],
                preferred_element_type=jnp.float32) + b_ref[0]
    h = jnp.maximum(h, 0.0)

    # k block-diagonal hidden FC levels (one matmul per level).
    for l in range(k):                              # k is small & static
        h = jnp.dot(h.astype(compute_dtype), wfc_ref[l],
                    preferred_element_type=jnp.float32) + b_ref[1 + l]
        h = jnp.maximum(h, 0.0)

    hc = h.astype(compute_dtype)
    # Fused down-projections: m_all sums every t1 step's m at its absolute
    # output columns (disjoint, zero elsewhere); add sums the last t1 step's b
    # and every t2 step's b at their columns.
    m_all = (jnp.dot(hc, wdn_ref[0], preferred_element_type=jnp.float32)
             + b_ref[k + 1][:, :n_pad])
    add = (jnp.dot(hc, wdn_ref[1], preferred_element_type=jnp.float32)
           + b_ref[k + 2][:, :n_pad])

    cols = jax.lax.broadcasted_iota(jnp.int32, (1, n_pad), 1)
    # Only the last segment of y reaches z multiplicatively; exp(0)=1 elsewhere.
    scale_mask = (cols >= last_seg_start).astype(jnp.float32)
    z = jnp.exp(m_all * scale_mask) * x + add       # f32 epilogue

    # log-det: padded / non-target columns of m_all are exactly zero, so the
    # full-lane sum equals sum_j torch.sum(m_j, dim=1).
    ld = jnp.sum(m_all, axis=1, keepdims=True)

    # Single lane-dense store: z in columns [0, n), logdet folded into ld_col.
    out_ref[...] = jnp.where(cols == ld_col, ld, z)


def affine_steps_forward(x, packed, *, sizes, k):
    sizes = list(sizes)
    seg = len(sizes)
    n = sum(sizes)
    s = x.shape[0]
    if seg <= 1:                                    # seg == 1: identity, logdet 0
        return x, jnp.zeros((s,), jnp.float32)

    offs = np.cumsum([0] + sizes).tolist()
    n_pad, w_pad = packed["W_up"].shape
    compute_dtype = packed["W_up"].dtype            # f32, or bf16 for v6e/v7x MXU

    # Pad batch to a sublane multiple; tile batches > 512 rows across the grid.
    sp = -(-s // 8) * 8
    if sp <= 512:
        bs = sp
    else:
        bs = 512
        sp = -(-sp // bs) * bs
    x_pad = jnp.zeros((sp, n_pad), jnp.float32).at[:s, :n].set(
        x.astype(jnp.float32))

    kernel = functools.partial(
        affine_steps_kernel, k=k, last_seg_start=offs[seg - 1],
        ld_col=n_pad - 1, compute_dtype=compute_dtype)

    out = pl.pallas_call(
        kernel,
        out_shape=jax.ShapeDtypeStruct((sp, n_pad), jnp.float32),
        grid=(sp // bs,),
        in_specs=[
            pl.BlockSpec((bs, n_pad), lambda i: (i, 0)),            # x tile
            pl.BlockSpec((n_pad, w_pad), lambda i: (0, 0)),          # W_up
            pl.BlockSpec((k, w_pad, w_pad), lambda i: (0, 0, 0)),    # W_fc
            pl.BlockSpec((2, w_pad, n_pad), lambda i: (0, 0, 0)),    # W_dn
            pl.BlockSpec((k + 3, 1, w_pad), lambda i: (0, 0, 0)),    # biases
        ],
        out_specs=pl.BlockSpec((bs, n_pad), lambda i: (i, 0)),
        compiler_params=pltpu.CompilerParams(
            dimension_semantics=("parallel",)),
    )(x_pad, packed["W_up"], packed["W_fc"], packed["W_dn"], packed["B_all"])

    return out[:s, :n], out[:s, n_pad - 1]


# ----------------------------------------------------------------------------
# Parameter initialization (PyTorch-Linear-style uniform init, deterministic)
# ----------------------------------------------------------------------------
def _init_linear(key, in_f, out_f, scale=1.0):
    kw, kb = jax.random.split(key)
    bound = 1.0 / math.sqrt(in_f)
    w = jax.random.uniform(kw, (in_f, out_f), jnp.float32, -bound, bound) * scale
    b = jax.random.uniform(kb, (1, out_f), jnp.float32, -bound, bound) * scale
    return w, b


def _init_tfc(key, start, end, k, hidden, mult):
    keys = jax.random.split(key, 2 * (k + 2))
    p = {}

    def branch(prefix, koff):
        wu, bu = _init_linear(keys[koff], start, hidden)
        wf, bf = [], []
        for i in range(k):
            w, b = _init_linear(keys[koff + 1 + i], hidden, hidden)
            wf.append(w)
            bf.append(b)
        wd, bd = _init_linear(keys[koff + 1 + k], hidden, end,
                              scale=math.sqrt(float(end) / hidden))
        p[f"{prefix}_up_w"], p[f"{prefix}_up_b"] = wu, bu
        p[f"{prefix}_fc_w"], p[f"{prefix}_fc_b"] = jnp.stack(wf), jnp.stack(bf)
        p[f"{prefix}_dn_w"], p[f"{prefix}_dn_b"] = wd, bd

    branch("b", 0)
    if mult:
        branch("m", k + 2)
    return p


def init_affine_steps(key, sizes, k, hidden):
    seg = len(sizes)
    n = sum(sizes)
    offs = np.cumsum([0] + list(sizes)).tolist()
    k1, k2 = jax.random.split(key)
    keys1 = jax.random.split(k1, max(seg - 1, 1))
    keys2 = jax.random.split(k2, max(seg - 1, 1))
    # t1[i-1] = transformerFC(sum(sizes[:i]), sizes[i], mult=True)
    t1 = [_init_tfc(keys1[i - 1], offs[i], sizes[i], k, hidden, True)
          for i in range(1, seg)]
    # t2[j] (torch loop var i = seg-1-j) = transformerFC(sum(sizes[j+1:]), sizes[j], mult=False)
    t2 = [_init_tfc(keys2[j], n - offs[j + 1], sizes[j], k, hidden, False)
          for j in range(seg - 1)]
    return {"t1": t1, "t2": t2}


# ----------------------------------------------------------------------------
# Pack every live branch of every step into 4 lane-dense weight/bias slabs.
# Hidden-slab layout (width (2J+1)*H, padded to w_pad):
#   cols [j*H,(j+1)*H)          : t1 step j, m-branch hidden
#   cols [J*H,(J+1)*H)          : t1 LAST step, b-branch hidden
#   cols [(J+1+j)*H,(J+2+j)*H)  : t2 step j, b-branch hidden
# Padding stays exactly zero so fused matmuls / the full-lane logdet are exact.
# ----------------------------------------------------------------------------
def pack_params(params, sizes, hidden, k, weight_dtype=jnp.float32):
    seg = len(sizes)
    n = sum(sizes)
    J = seg - 1
    H = hidden
    assert J >= 1
    offs = np.cumsum([0] + list(sizes)).tolist()

    n_pad = (-(-(n + 1) // 128)) * 128              # spare column for logdet
    w = (2 * J + 1) * H
    w_pad = max(128, (-(-w // 128)) * 128)

    W_up = np.zeros((n_pad, w_pad), np.float32)
    W_fc = np.zeros((k, w_pad, w_pad), np.float32)
    W_dn = np.zeros((2, w_pad, n_pad), np.float32)   # [0]=m-down, [1]=add-down
    B_all = np.zeros((k + 3, 1, w_pad), np.float32)  # up, fc[0..k-1], m-b, add-b

    def fill_branch(p, prefix, c0, base_lo, base_hi, tgt_lo, tgt_hi, dn_idx):
        W_up[base_lo:base_hi, c0:c0 + H] = np.asarray(p[f"{prefix}_up_w"])
        B_all[0, 0, c0:c0 + H] = np.asarray(p[f"{prefix}_up_b"][0])
        for l in range(k):
            W_fc[l, c0:c0 + H, c0:c0 + H] = np.asarray(p[f"{prefix}_fc_w"][l])
            B_all[1 + l, 0, c0:c0 + H] = np.asarray(p[f"{prefix}_fc_b"][l, 0])
        W_dn[dn_idx, c0:c0 + H, tgt_lo:tgt_hi] = np.asarray(p[f"{prefix}_dn_w"])
        B_all[k + 1 + dn_idx, 0, tgt_lo:tgt_hi] = np.asarray(p[f"{prefix}_dn_b"][0])

    # t1 m-branches: base = x[:, :offs[j+1]], target cols [offs[j+1], offs[j+2])
    for j in range(J):
        fill_branch(params["t1"][j], "m", j * H,
                    0, offs[j + 1], offs[j + 1], offs[j + 2], 0)
    # t1 last-step b-branch: the only t1 additive branch that reaches z.
    # (Earlier t1 b-branches only affect y's interior columns, which torch
    # discards — dead compute, intentionally skipped; outputs are unchanged.)
    fill_branch(params["t1"][J - 1], "b", J * H,
                0, offs[J], offs[J], offs[J + 1], 1)
    # t2 b-branches (applied to ORIGINAL x): base = x[:, offs[j+1]:],
    # target cols [offs[j], offs[j+1])
    for j in range(J):
        fill_branch(params["t2"][j], "b", (J + 1 + j) * H,
                    offs[j + 1], n, offs[j], offs[j + 1], 1)

    return {
        "W_up": jnp.asarray(W_up, weight_dtype),
        "W_fc": jnp.asarray(W_fc, weight_dtype),
        "W_dn": jnp.asarray(W_dn, weight_dtype),
        "B_all": jnp.asarray(B_all, jnp.float32),    # biases stay f32
    }


# ----------------------------------------------------------------------------
# Pure-JAX reference: direct transliteration of the torch forward
# ----------------------------------------------------------------------------
def _mlp_ref(base, p, prefix, k):
    h = jnp.maximum(base @ p[f"{prefix}_up_w"] + p[f"{prefix}_up_b"], 0.0)
    for i in range(k):
        h = jnp.maximum(h @ p[f"{prefix}_fc_w"][i] + p[f"{prefix}_fc_b"][i], 0.0)
    return h @ p[f"{prefix}_dn_w"] + p[f"{prefix}_dn_b"]


def affine_steps_ref(x, params, sizes, k):
    seg = len(sizes)
    s = x.shape[0]
    ys, l = [], jnp.zeros((s,), jnp.float32)
    for i in range(1, seg):
        p = params["t1"][i - 1]
        target = x[:, sum(sizes[:i]):sum(sizes[:i + 1])]
        base = x[:, :sum(sizes[:i])]
        m = _mlp_ref(base, p, "m", k)
        b = _mlp_ref(base, p, "b", k)
        ys.append(jnp.exp(m) * target + b)
        l = l + jnp.sum(m, axis=1)
    y = jnp.concatenate([x[:, :sizes[0]]] + ys, axis=1)
    zs = []
    for i in range(seg - 1, 0, -1):
        p = params["t2"][-i]                          # torch: self.t2[-i]
        target = x[:, -sum(sizes[-1 - i:]): -sum(sizes[-i:])]
        base = x[:, -sum(sizes[-i:]):]
        b = _mlp_ref(base, p, "b", k)
        zs.append(target + b)                         # mult=False: y = x + b
    z = jnp.concatenate(zs + [y[:, -sizes[-1]:]], axis=1)
    return z, l


# ----------------------------------------------------------------------------
if __name__ == "__main__":
    n, max_seg, k, hidden, batch = 10, 4, 2, 32, 8
    seg = min(n, max_seg)
    step = n // seg
    extra = n - step * seg
    sizes = [step + 1] * extra + [step] * (seg - extra)   # -> [3, 3, 2, 2]

    key = jax.random.PRNGKey(0)
    pkey, xkey = jax.random.split(key)
    params = init_affine_steps(pkey, sizes, k, hidden)
    x = jax.random.normal(xkey, (batch, n), jnp.float32)

    z_ref, l_ref = affine_steps_ref(x, params, sizes, k)

    # --- f32 path (asserted at tight tolerance against the f32 reference) ---
    packed = pack_params(params, sizes, hidden, k, weight_dtype=jnp.float32)
    fwd = jax.jit(functools.partial(affine_steps_forward, sizes=tuple(sizes), k=k))
    z, logdet = jax.block_until_ready(fwd(x, packed))
    np.testing.assert_allclose(np.asarray(z), np.asarray(z_ref),
                               rtol=2e-3, atol=2e-3)
    np.testing.assert_allclose(np.asarray(logdet), np.asarray(l_ref),
                               rtol=2e-3, atol=2e-3)

    # --- bf16 MXU-operand path (v6e/v7x fast path; f32 accum + f32 epilogue) ---
    packed_bf16 = pack_params(params, sizes, hidden, k, weight_dtype=jnp.bfloat16)
    fwd_bf16 = jax.jit(functools.partial(affine_steps_forward,
                                         sizes=tuple(sizes), k=k))
    z_bf, l_bf = jax.block_until_ready(fwd_bf16(x, packed_bf16))
    np.testing.assert_allclose(np.asarray(z_bf), np.asarray(z_ref),
                               rtol=1e-1, atol=1e-1)
    np.testing.assert_allclose(np.asarray(l_bf), np.asarray(l_ref),
                               rtol=1e-1, atol=1e-1)

    print("KERNEL_OK")
</pallas_src>

<mosaic_0001>
module attributes {stable_mosaic.version = 11 : i64} {
  func.func @affine_steps_kernel(%arg0: i32, %arg1: memref<8x128xf32, #tpu.memory_space<vmem>>, %arg2: memref<128x256xf32, #tpu.memory_space<vmem>>, %arg3: memref<2x256x256xf32, #tpu.memory_space<vmem>>, %arg4: memref<2x256x128xf32, #tpu.memory_space<vmem>>, %arg5: memref<5x1x256xf32, #tpu.memory_space<vmem>>, %arg6: memref<8x128xf32, #tpu.memory_space<vmem>>) attributes {dimension_semantics = [#tpu.dimension_semantics<parallel>], iteration_bounds = array<i64: 1>, scalar_prefetch = 0 : i64, scratch_operands = 0 : i64, tpu.core_type = #tpu.core_type<tc>, window_params = [{transform_indices = @transform_0, window_bounds = array<i64: 8, 128>}, {pipeline_mode = #tpu.pipeline_mode<synchronous>, transform_indices = @transform_1, window_bounds = array<i64: 128, 256>}, {pipeline_mode = #tpu.pipeline_mode<synchronous>, transform_indices = @transform_2, window_bounds = array<i64: 2, 256, 256>}, {pipeline_mode = #tpu.pipeline_mode<synchronous>, transform_indices = @transform_3, window_bounds = array<i64: 2, 256, 128>}, {pipeline_mode = #tpu.pipeline_mode<synchronous>, transform_indices = @transform_4, window_bounds = array<i64: 5, 1, 256>}, {transform_indices = @transform_5, window_bounds = array<i64: 8, 128>}]} {
    %c0 = arith.constant 0 : index
    %c0_0 = arith.constant 0 : index
    %0 = vector.load %arg1[%c0, %c0_0] : memref<8x128xf32, #tpu.memory_space<vmem>>, vector<8x128xf32>
    %c0_1 = arith.constant 0 : index
    %c0_2 = arith.constant 0 : index
    %1 = vector.load %arg2[%c0_1, %c0_2] : memref<128x256xf32, #tpu.memory_space<vmem>>, vector<128x256xf32>
    %cst = arith.constant dense<0.000000e+00> : vector<8x256xf32>
    %2 = tpu.matmul %0, %1, %cst {dimension_numbers = #tpu.dot_dimension_numbers<[1], [0], [0], [1], [0, 0, 1, 1], [], []>} : vector<8x128xf32>, vector<128x256xf32>, vector<8x256xf32> -> vector<8x256xf32>
    %c0_3 = arith.constant 0 : index
    %c0_4 = arith.constant 0 : index
    %c0_5 = arith.constant 0 : index
    %3 = vector.load %arg5[%c0_3, %c0_4, %c0_5] : memref<5x1x256xf32, #tpu.memory_space<vmem>>, vector<1x1x256xf32>
    %4 = vector.shape_cast %3 : vector<1x1x256xf32> to vector<1x256xf32>
    %5 = vector.broadcast %4 : vector<1x256xf32> to vector<8x256xf32>
    %6 = arith.addf %2, %5 : vector<8x256xf32>
    %cst_6 = arith.constant 0.000000e+00 : f32
    %7 = vector.broadcast %cst_6 : f32 to vector<8x256xf32>
    %8 = arith.maximumf %6, %7 : vector<8x256xf32>
    %c0_7 = arith.constant 0 : index
    %c0_8 = arith.constant 0 : index
    %c0_9 = arith.constant 0 : index
    %9 = vector.load %arg3[%c0_7, %c0_8, %c0_9] : memref<2x256x256xf32, #tpu.memory_space<vmem>>, vector<1x256x256xf32>
    %10 = vector.shape_cast %9 : vector<1x256x256xf32> to vector<256x256xf32>
    %cst_10 = arith.constant dense<0.000000e+00> : vector<8x256xf32>
    %11 = tpu.matmul %8, %10, %cst_10 {dimension_numbers = #tpu.dot_dimension_numbers<[1], [0], [0], [1], [0, 0, 1, 1], [], []>} : vector<8x256xf32>, vector<256x256xf32>, vector<8x256xf32> -> vector<8x256xf32>
    %c1 = arith.constant 1 : index
    %c0_11 = arith.constant 0 : index
    %c0_12 = arith.constant 0 : index
    %12 = vector.load %arg5[%c1, %c0_11, %c0_12] : memref<5x1x256xf32, #tpu.memory_space<vmem>>, vector<1x1x256xf32>
    %13 = vector.shape_cast %12 : vector<1x1x256xf32> to vector<1x256xf32>
    %14 = vector.broadcast %13 : vector<1x256xf32> to vector<8x256xf32>
    %15 = arith.addf %11, %14 : vector<8x256xf32>
    %cst_13 = arith.constant 0.000000e+00 : f32
    %16 = vector.broadcast %cst_13 : f32 to vector<8x256xf32>
    %17 = arith.maximumf %15, %16 : vector<8x256xf32>
    %c1_14 = arith.constant 1 : index
    %c0_15 = arith.constant 0 : index
    %c0_16 = arith.constant 0 : index
    %18 = vector.load %arg3[%c1_14, %c0_15, %c0_16] : memref<2x256x256xf32, #tpu.memory_space<vmem>>, vector<1x256x256xf32>
    %19 = vector.shape_cast %18 : vector<1x256x256xf32> to vector<256x256xf32>
    %cst_17 = arith.constant dense<0.000000e+00> : vector<8x256xf32>
    %20 = tpu.matmul %17, %19, %cst_17 {dimension_numbers = #tpu.dot_dimension_numbers<[1], [0], [0], [1], [0, 0, 1, 1], [], []>} : vector<8x256xf32>, vector<256x256xf32>, vector<8x256xf32> -> vector<8x256xf32>
    %c2 = arith.constant 2 : index
    %c0_18 = arith.constant 0 : index
    %c0_19 = arith.constant 0 : index
    %21 = vector.load %arg5[%c2, %c0_18, %c0_19] : memref<5x1x256xf32, #tpu.memory_space<vmem>>, vector<1x1x256xf32>
    %22 = vector.shape_cast %21 : vector<1x1x256xf32> to vector<1x256xf32>
    %23 = vector.broadcast %22 : vector<1x256xf32> to vector<8x256xf32>
    %24 = arith.addf %20, %23 : vector<8x256xf32>
    %cst_20 = arith.constant 0.000000e+00 : f32
    %25 = vector.broadcast %cst_20 : f32 to vector<8x256xf32>
    %26 = arith.maximumf %24, %25 : vector<8x256xf32>
    %c0_21 = arith.constant 0 : index
    %c0_22 = arith.constant 0 : index
    %c0_23 = arith.constant 0 : index
    %27 = vector.load %arg4[%c0_21, %c0_22, %c0_23] : memref<2x256x128xf32, #tpu.memory_space<vmem>>, vector<1x256x128xf32>
    %28 = vector.shape_cast %27 : vector<1x256x128xf32> to vector<256x128xf32>
    %cst_24 = arith.constant dense<0.000000e+00> : vector<8x128xf32>
    %29 = tpu.matmul %26, %28, %cst_24 {dimension_numbers = #tpu.dot_dimension_numbers<[1], [0], [0], [1], [0, 0, 1, 1], [], []>} : vector<8x256xf32>, vector<256x128xf32>, vector<8x128xf32> -> vector<8x128xf32>
    %c3 = arith.constant 3 : index
    %c0_25 = arith.constant 0 : index
    %c0_26 = arith.constant 0 : index
    %30 = vector.load %arg5[%c3, %c0_25, %c0_26] : memref<5x1x256xf32, #tpu.memory_space<vmem>>, vector<1x1x256xf32>
    %31 = vector.shape_cast %30 : vector<1x1x256xf32> to vector<1x256xf32>
    %32 = vector.extract_strided_slice %31 {offsets = [0, 0], sizes = [1, 128], strides = [1, 1]} : vector<1x256xf32> to vector<1x128xf32>
    %33 = vector.broadcast %32 : vector<1x128xf32> to vector<8x128xf32>
    %34 = arith.addf %29, %33 : vector<8x128xf32>
    %c1_27 = arith.constant 1 : index
    %c0_28 = arith.constant 0 : index
    %c0_29 = arith.constant 0 : index
    %35 = vector.load %arg4[%c1_27, %c0_28, %c0_29] : memref<2x256x128xf32, #tpu.memory_space<vmem>>, vector<1x256x128xf32>
    %36 = vector.shape_cast %35 : vector<1x256x128xf32> to vector<256x128xf32>
    %cst_30 = arith.constant dense<0.000000e+00> : vector<8x128xf32>
    %37 = tpu.matmul %26, %36, %cst_30 {dimension_numbers = #tpu.dot_dimension_numbers<[1], [0], [0], [1], [0, 0, 1, 1], [], []>} : vector<8x256xf32>, vector<256x128xf32>, vector<8x128xf32> -> vector<8x128xf32>
    %c4 = arith.constant 4 : index
    %c0_31 = arith.constant 0 : index
    %c0_32 = arith.constant 0 : index
    %38 = vector.load %arg5[%c4, %c0_31, %c0_32] : memref<5x1x256xf32, #tpu.memory_space<vmem>>, vector<1x1x256xf32>
    %39 = vector.shape_cast %38 : vector<1x1x256xf32> to vector<1x256xf32>
    %40 = vector.extract_strided_slice %39 {offsets = [0, 0], sizes = [1, 128], strides = [1, 1]} : vector<1x256xf32> to vector<1x128xf32>
    %41 = vector.broadcast %40 : vector<1x128xf32> to vector<8x128xf32>
    %42 = arith.addf %37, %41 : vector<8x128xf32>
    %43 = tpu.iota {dimensions = array<i32: 1>} : vector<1x128xi32>
    %c8_i32 = arith.constant 8 : i32
    %44 = vector.broadcast %c8_i32 : i32 to vector<1x128xi32>
    %45 = arith.cmpi sge, %43, %44 : vector<1x128xi32>
    %46 = arith.extui %45 : vector<1x128xi1> to vector<1x128xi32>
    %47 = arith.sitofp %46 : vector<1x128xi32> to vector<1x128xf32>
    %48 = vector.broadcast %47 : vector<1x128xf32> to vector<8x128xf32>
    %49 = arith.mulf %34, %48 : vector<8x128xf32>
    %50 = math.exp %49 : vector<8x128xf32>
    %51 = arith.mulf %50, %0 : vector<8x128xf32>
    %52 = arith.addf %51, %42 : vector<8x128xf32>
    %cst_33 = arith.constant dense<0.000000e+00> : vector<8xf32>
    %53 = vector.multi_reduction <add>, %34, %cst_33 [1] : vector<8x128xf32> to vector<8xf32>
    %54 = vector.shape_cast %53 : vector<8xf32> to vector<8x1xf32>
    %c127_i32 = arith.constant 127 : i32
    %55 = vector.broadcast %c127_i32 : i32 to vector<1x128xi32>
    %56 = arith.cmpi eq, %43, %55 : vector<1x128xi32>
    %57 = vector.shape_cast %56 : vector<1x128xi1> to vector<1x128xi1>
    %58 = vector.broadcast %57 : vector<1x128xi1> to vector<8x128xi1>
    %59 = vector.shape_cast %54 : vector<8x1xf32> to vector<8x1xf32>
    %60 = vector.broadcast %59 : vector<8x1xf32> to vector<8x128xf32>
    %61 = arith.select %58, %60, %52 : vector<8x128xi1>, vector<8x128xf32>
    %c0_34 = arith.constant 0 : index
    %c0_35 = arith.constant 0 : index
    %62 = vector.load %arg6[%c0_34, %c0_35] : memref<8x128xf32, #tpu.memory_space<vmem>>, vector<8x128xf32>
    tpu.vector_store %arg6[%c0_34, %c0_35], %61 {strides = array<i32>} : memref<8x128xf32, #tpu.memory_space<vmem>>, vector<8x128xf32>,
    return
  }
  func.func @transform_0(%arg0: i32) -> (i32, i32) {
    %c0_i32 = arith.constant 0 : i32
    %c0_i32_0 = arith.constant 0 : i32
    return %arg0, %c0_i32 : i32, i32
  }
  func.func @transform_1(%arg0: i32) -> (i32, i32) {
    %c0_i32 = arith.constant 0 : i32
    %c0_i32_0 = arith.constant 0 : i32
    %c0_i32_1 = arith.constant 0 : i32
    return %c0_i32, %c0_i32_0 : i32, i32
  }
  func.func @transform_2(%arg0: i32) -> (i32, i32, i32) {
    %c0_i32 = arith.constant 0 : i32
    %c0_i32_0 = arith.constant 0 : i32
    %c0_i32_1 = arith.constant 0 : i32
    %c0_i32_2 = arith.constant 0 : i32
    return %c0_i32, %c0_i32_0, %c0_i32_1 : i32, i32, i32
  }
  func.func @transform_3(%arg0: i32) -> (i32, i32, i32) {
    %c0_i32 = arith.constant 0 : i32
    %c0_i32_0 = arith.constant 0 : i32
    %c0_i32_1 = arith.constant 0 : i32
    %c0_i32_2 = arith.constant 0 : i32
    return %c0_i32, %c0_i32_0, %c0_i32_1 : i32, i32, i32
  }
  func.func @transform_4(%arg0: i32) -> (i32, i32, i32) {
    %c0_i32 = arith.constant 0 : i32
    %c0_i32_0 = arith.constant 0 : i32
    %c0_i32_1 = arith.constant 0 : i32
    %c0_i32_2 = arith.constant 0 : i32
    return %c0_i32, %c0_i32_0, %c0_i32_1 : i32, i32, i32
  }
  func.func @transform_5(%arg0: i32) -> (i32, i32) {
    %c0_i32 = arith.constant 0 : i32
    %c0_i32_0 = arith.constant 0 : i32
    return %arg0, %c0_i32 : i32, i32
  }
}

</mosaic_0001>

<bundles_post_ra>
// kernel: affine_steps_forward.1
= control target key start
LH: loop header
LB: loop body
LE: loop exit
PB: predicated region body
PF: predicated region fallthrough
CT: control target
= control target key end

     0   :  { %10 = vsyncpa [#allocation3], 0  ;;  %s1230_s0 = inlined_call_operand.vmem [shape: f32[8,128], index: 0, kind: input, shape index: {}]   ;;  %s1231_s1 = inlined_call_operand.hbm [shape: f32[128,256], index: 1, kind: input, shape index: {}]   ;;  %s1232_s2 = inlined_call_operand.hbm [shape: f32[2,256,256], index: 2, kind: input, shape index: {}]   ;;  %s1233_s3 = inlined_call_operand.hbm [shape: f32[2,256,128], index: 3, kind: input, shape index: {}]   ;;  %s1234_s4 = inlined_call_operand.vmem [shape: f32[5,1,256], index: 4, kind: input, shape index: {}]   ;;  %s1235_s5 = inlined_call_operand.vmem [shape: f32[8,128], index: 5, kind: output, shape index: {}]  }
   0x1   :  { %11 = vsyncpa [#allocation5], 0  ;;  %s1103_s18 = smov [#allocation4]   ;;  %s1104_s20 = smov [#allocation2]  }
   0x2   :  { %s31_s19 = sshll.u32 %s1103_s18, 4  ;;  %s19_s21 = sshll.u32 %s1104_s20, 4  ;;  %s32_s19 = int_to_ptr.vmem [resolvable:$true] %s31_s19  ;;  %s1141_s21 = int_to_ptr.vmem [resolvable:$true] %s19_s21 }
   0x3   :  { %s1033_s24 = scalar_lea.hbm %s1232_s2, 16384 }
   0x4   :  { %p1034_p0 = scmp.ne.s32.totalorder %s1232_s2, %s1033_s24  ;;  %p1037_p1 = scmp.lt.u32.totalorder %s1033_s24, %s1232_s2 }
   0x6   :  { %p1039_p2 = pnand %p1037_p1, %p1034_p0 }
   0x8   :  { %1042 = shalt.err (!%p1039_p2)
}
   0x9   :  { %s1043_s29 = scalar_lea.vmem %s32_s19, 16384  ;;  %p1048_p4 = scmp.lt.s32.totalorder %s32_s19, %s32_s19 }
   0xa   :  { %p1044_p3 = scmp.ne.s32.totalorder %s32_s19, %s1043_s29  ;;  %p1049_p5 = scmp.lt.s32.totalorder %s1043_s29, %s1043_s29 }
   0xc   :  { %p1050_p6 = por %p1049_p5, %p1048_p4 }
   0xe   :  { %p1051_p7 = pnand %p1050_p6, %p1044_p3 }
  0x10   :  { %1054 = shalt.err (!%p1051_p7)
}
  0x11   :  { %s1105_s30 = smov 256   ;;  %s1106_s6 = smov 16  }
  0x12   :  { %37 = dma.hbm_to_vmem [thread:$0]  %s1232_s2, 16384, %s32_s19, [#allocation5], %s1105_s30, %s1105_s30, %s1106_s6  }
  0x13   :  { %s1055_s11 = scalar_lea.hbm %s1231_s1, 4096 }
  0x14   :  { %p1056_p8 = scmp.ne.s32.totalorder %s1231_s1, %s1055_s11  ;;  %p1059_p9 = scmp.lt.u32.totalorder %s1055_s11, %s1231_s1 }
  0x16   :  { %p1061_p10 = pnand %p1059_p9, %p1056_p8 }
  0x18   :  { %1064 = shalt.err (!%p1061_p10)
}
  0x19   :  { %s1065_s16 = scalar_lea.vmem %s1141_s21, 4096  ;;  %p1070_p12 = scmp.lt.s32.totalorder %s1141_s21, %s1141_s21 }
  0x1a   :  { %p1066_p11 = scmp.ne.s32.totalorder %s1141_s21, %s1065_s16  ;;  %p1071_p13 = scmp.lt.s32.totalorder %s1065_s16, %s1065_s16 }
  0x1c   :  { %p1072_p0 = por %p1071_p13, %p1070_p12 }
  0x1e   :  { %p1073_p1 = pnand %p1072_p0, %p1066_p11 }
  0x20   :  { %1076 = shalt.err (!%p1073_p1)
}
  0x21   :  { %25 = dma.hbm_to_vmem [thread:$0]  %s1231_s1, 4096, %s1141_s21, [#allocation3], %s1105_s30, %s1105_s30, %s1106_s6  }
  0x22   :  { %s1107_s18 = smov [#allocation6]   ;;  %s1077_s23 = scalar_lea.hbm %s1233_s3, 8192 }
  0x23   :  { %s43_s19 = sshll.u32 %s1107_s18, 4  ;;  %p1078_p2 = scmp.ne.s32.totalorder %s1233_s3, %s1077_s23  ;;  %s44_s19 = int_to_ptr.vmem [resolvable:$true] %s43_s19 }
  0x24   :  { %p1081_p3 = scmp.lt.u32.totalorder %s1077_s23, %s1233_s3 }
  0x26   :  { %p1083_p4 = pnand %p1081_p3, %p1078_p2 }
  0x28   :  { %1086 = shalt.err (!%p1083_p4)
}
  0x29   :  { %s1087_s28 = scalar_lea.vmem %s44_s19, 8192  ;;  %p1092_p6 = scmp.lt.s32.totalorder %s44_s19, %s44_s19 }
  0x2a   :  { %p1088_p5 = scmp.ne.s32.totalorder %s44_s19, %s1087_s28  ;;  %p1093_p7 = scmp.lt.s32.totalorder %s1087_s28, %s1087_s28 }
  0x2c   :  { %p1094_p8 = por %p1093_p7, %p1092_p6 }
  0x2e   :  { %p1095_p9 = pnand %p1094_p8, %p1088_p5 }
  0x30   :  { %1098 = shalt.err (!%p1095_p9)
}
  0x31   :  { %s1108_s1 = smov 128   ;;  %s1109_s21 = smov 8  }
  0x32   :  { %49 = dma.hbm_to_vmem [thread:$0]  %s1233_s3, 8192, %s44_s19, [#allocation5], %s1108_s1, %s1108_s1, %s1109_s21  }
  0x33   :  { %1099 = dma.done.wait [#allocation3], 4096  }
  0x34   :  { %1100 = vsyncadd [#allocation3], 4294963200 }
  0x35   :  { %1101 = dma.done.wait [#allocation5], 24576  }
  0x36   :  { %1102 = vsyncadd [#allocation5], 4294942720  ;;  %v96_v0 = vlaneseq  ;;  %v1110_v1 = vmov 0.0   ;;  %v63_v4 = vld [vmem:[#allocation2 + $0x8] sm:$0xff]  ;;  %v65_v5 = vld [vmem:[#allocation2 + $0x18] sm:$0xff] }
  0x37   :  { %170 = vmatprep.mubr.f32.mxu0 %v1110_v1  ;;  %v62_v6 = vld [vmem:[#allocation2] sm:$0xff]  ;;  %v799_v7 = vpack.c.bf16 %v65_v5, %v63_v4  ;;  %v64_v8 = vld [vmem:[#allocation2 + $0x10] sm:$0xff]  ;;  %v67_v9 = vld [vmem:[#allocation2 + $0x28] sm:$0xff] }
  0x38   :  { %v1185_v2 = vand.u32 127, %v96_v0  ;;  %v69_v10 = vld [vmem:[#allocation2 + $0x38] sm:$0xff]  ;;  %v801_v11 = vpack.c.bf16 %v64_v8, %v62_v6  ;;  %v66_v13 = vld [vmem:[#allocation2 + $0x20] sm:$0xff]  ;;  %v68_v14 = vld [vmem:[#allocation2 + $0x30] sm:$0xff] }
  0x39   :  { %v803_v12 = vpack.c.bf16 %v69_v10, %v67_v9  ;;  %v71_v15 = vld [vmem:[#allocation2 + $0x48] sm:$0xff]  ;;  %800 = vmatprep.subr.bf16.mxu0 %v799_v7  ;;  %v73_v16 = vld [vmem:[#allocation2 + $0x58] sm:$0xff]  ;;  %v805_v17 = vpack.c.bf16 %v68_v14, %v66_v13  ;;  %v70_v19 = vld [vmem:[#allocation2 + $0x40] sm:$0xff] }
  0x3a   :  { %vm703_vm0 = vcmp.ge.s32.totalorder %v1185_v2, 8  ;;  %802 = vmatpush1.bf16.msra.mxu0 %v801_v11  ;;  %v807_v18 = vpack.c.bf16 %v73_v16, %v71_v15  ;;  %v72_v20 = vld [vmem:[#allocation2 + $0x50] sm:$0xff]  ;;  %v75_v21 = vld [vmem:[#allocation2 + $0x68] sm:$0xff]  ;;  %v77_v22 = vld [vmem:[#allocation2 + $0x78] sm:$0xff]  ;;  %vm713_vm1 = vcmp.eq.s32.totalorder %v1185_v2, 127 }
  0x3b   :  { %v1188_v3 = vsel %vm703_vm0, 1.0, %v1110_v1  ;;  %804 = vmatprep.subr.bf16.mxu0 %v803_v12  ;;  %v809_v23 = vpack.c.bf16 %v72_v20, %v70_v19  ;;  %v811_v24 = vpack.c.bf16 %v77_v22, %v75_v21  ;;  %v74_v25 = vld [vmem:[#allocation2 + $0x60] sm:$0xff]  ;;  %v76_v26 = vld [vmem:[#allocation2 + $0x70] sm:$0xff]  ;;  %v79_v27 = vld [vmem:[#allocation2 + $0x88] sm:$0xff] }
  0x3c   :  { %v81_v28 = vld [vmem:[#allocation2 + $0x98] sm:$0xff]  ;;  %v78_v29 = vld [vmem:[#allocation2 + $0x80] sm:$0xff]  ;;  %v80_v30 = vld [vmem:[#allocation2 + $0x90] sm:$0xff]  ;;  %v813_v34 = vpack.c.bf16 %v76_v26, %v74_v25 }
  0x3d   :  { %v180_v31 = vld [vmem:[#allocation4 + $0x8] sm:$0xff]  ;;  %v182_v32 = vld [vmem:[#allocation4 + $0x18] sm:$0xff]  ;;  %v179_v33 = vld [vmem:[#allocation4] sm:$0xff]  ;;  %v815_v39 = vpack.c.bf16 %v81_v28, %v79_v27  ;;  %v817_v49 = vpack.c.bf16 %v80_v30, %v78_v29 }
  0x3e   :  { %806 = vmatpush1.bf16.msra.mxu0 %v805_v17  ;;  %v831_v35 = vpack.c.bf16 %v182_v32, %v180_v31  ;;  %v181_v36 = vld [vmem:[#allocation4 + $0x10] sm:$0xff]  ;;  %v184_v37 = vld [vmem:[#allocation4 + $0x28] sm:$0xff]  ;;  %v186_v38 = vld [vmem:[#allocation4 + $0x38] sm:$0xff] }
  0x3f   :  { %808 = vmatprep.subr.bf16.mxu0 %v807_v18  ;;  %v833_v40 = vpack.c.bf16 %v181_v36, %v179_v33  ;;  %v835_v41 = vpack.c.bf16 %v186_v38, %v184_v37  ;;  %v183_v42 = vld [vmem:[#allocation4 + $0x20] sm:$0xff]  ;;  %v185_v43 = vld [vmem:[#allocation4 + $0x30] sm:$0xff]  ;;  %v188_v44 = vld [vmem:[#allocation4 + $0x48] sm:$0xff] }
  0x40   :  { %v83_v45 = vld [vmem:[#allocation2 + $0xa8] sm:$0xff]  ;;  %v85_v46 = vld [vmem:[#allocation2 + $0xb8] sm:$0xff]  ;;  %832 = vmatprep.subr.bf16.mxu1 %v831_v35  ;;  %v837_v48 = vpack.c.bf16 %v185_v43, %v183_v42  ;;  %v82_v50 = vld [vmem:[#allocation2 + $0xa0] sm:$0xff] }
  0x41   :  { %v190_v47 = vld [vmem:[#allocation4 + $0x58] sm:$0xff]  ;;  %834 = vmatpush1.bf16.msra.mxu1 %v833_v40  ;;  %v187_v52 = vld [vmem:[#allocation4 + $0x40] sm:$0xff]  ;;  %v189_v53 = vld [vmem:[#allocation4 + $0x50] sm:$0xff]  ;;  %v819_v54 = vpack.c.bf16 %v85_v46, %v83_v45 }
  0x42   :  { %810 = vmatpush1.bf16.msra.mxu0 %v809_v23  ;;  %836 = vmatprep.subr.bf16.mxu1 %v835_v41  ;;  %v839_v51 = vpack.c.bf16 %v190_v47, %v188_v44  ;;  %v84_v55 = vld [vmem:[#allocation2 + $0xb0] sm:$0xff]  ;;  %v192_v56 = vld [vmem:[#allocation4 + $0x68] sm:$0xff]  ;;  %v194_v57 = vld [vmem:[#allocation4 + $0x78] sm:$0xff]  ;;  %v841_v60 = vpack.c.bf16 %v189_v53, %v187_v52 }
  0x43   :  { %812 = vmatprep.subr.bf16.mxu0 %v811_v24  ;;  %v87_v58 = vld [vmem:[#allocation2 + $0xc8] sm:$0xff]  ;;  %v89_v59 = vld [vmem:[#allocation2 + $0xd8] sm:$0xff]  ;;  %v821_v61 = vpack.c.bf16 %v84_v55, %v82_v50  ;;  %v86_v62 = vld [vmem:[#allocation2 + $0xc0] sm:$0xff]  ;;  %v843_v63 = vpack.c.bf16 %v194_v57, %v192_v56 }
  0x44   :  { %v191_v1 = vld [vmem:[#allocation4 + $0x60] sm:$0xff]  ;;  %v193_v4 = vld [vmem:[#allocation4 + $0x70] sm:$0xff]  ;;  %v823_v5 = vpack.c.bf16 %v89_v59, %v87_v58  ;;  %v196_v7 = vld [vmem:[#allocation4 + $0x88] sm:$0xff] }
  0x45   :  { %838 = vmatpush1.bf16.msra.mxu1 %v837_v48  ;;  %v88_v6 = vld [vmem:[#allocation2 + $0xd0] sm:$0xff]  ;;  %v198_v8 = vld [vmem:[#allocation4 + $0x98] sm:$0xff]  ;;  %v91_v9 = vld [vmem:[#allocation2 + $0xe8] sm:$0xff]  ;;  %v845_v11 = vpack.c.bf16 %v193_v4, %v191_v1 }
  0x46   :  { %814 = vmatpush1.bf16.msra.mxu0 %v813_v34  ;;  %840 = vmatprep.subr.bf16.mxu1 %v839_v51  ;;  %v93_v10 = vld [vmem:[#allocation2 + $0xf8] sm:$0xff]  ;;  %v825_v12 = vpack.c.bf16 %v88_v6, %v86_v62  ;;  %v90_v13 = vld [vmem:[#allocation2 + $0xe0] sm:$0xff]  ;;  %v847_v14 = vpack.c.bf16 %v198_v8, %v196_v7  ;;  %v197_v16 = vld [vmem:[#allocation4 + $0x90] sm:$0xff] }
  0x47   :  { %816 = vmatprep.subr.bf16.mxu0 %v815_v39  ;;  %v195_v15 = vld [vmem:[#allocation4 + $0x80] sm:$0xff]  ;;  %v827_v17 = vpack.c.bf16 %v93_v10, %v91_v9  ;;  %v92_v18 = vld [vmem:[#allocation2 + $0xf0] sm:$0xff]  ;;  %v200_v19 = vld [vmem:[#allocation4 + $0xa8] sm:$0xff] }
  0x48   :  { %v202_v20 = vld [vmem:[#allocation4 + $0xb8] sm:$0xff]  ;;  %v849_v21 = vpack.c.bf16 %v197_v16, %v195_v15  ;;  %v829_v22 = vpack.c.bf16 %v92_v18, %v90_v13  ;;  %v199_v24 = vld [vmem:[#allocation4 + $0xa0] sm:$0xff]  ;;  %v201_v25 = vld [vmem:[#allocation4 + $0xb0] sm:$0xff] }
  0x49   :  { %842 = vmatpush1.bf16.msra.mxu1 %v841_v60  ;;  %v851_v23 = vpack.c.bf16 %v202_v20, %v200_v19  ;;  %v204_v26 = vld [vmem:[#allocation4 + $0xc8] sm:$0xff]  ;;  %v206_v27 = vld [vmem:[#allocation4 + $0xd8] sm:$0xff]  ;;  %v853_v28 = vpack.c.bf16 %v201_v25, %v199_v24  ;;  %v1193_v29 = vld [vmem:[%s1230_s0] sm:$0xff] }
  0x4a   :  { %818 = vmatpush1.bf16.msra.mxu0 %v817_v49  ;;  %844 = vmatprep.subr.bf16.mxu1 %v843_v63  ;;  %v855_v30 = vpack.c.bf16 %v206_v27, %v204_v26  ;;  %v203_v31 = vld [vmem:[#allocation4 + $0xc0] sm:$0xff]  ;;  %v205_v32 = vld [vmem:[#allocation4 + $0xd0] sm:$0xff]  ;;  %v208_v33 = vld [vmem:[#allocation4 + $0xe8] sm:$0xff] }
  0x4b   :  { %820 = vmatprep.subr.bf16.mxu0 %v819_v54  ;;  %v210_v34 = vld [vmem:[#allocation4 + $0xf8] sm:$0xff]  ;;  %v857_v35 = vpack.c.bf16 %v205_v32, %v203_v31  ;;  %v207_v37 = vld [vmem:[#allocation4 + $0xe0] sm:$0xff]  ;;  %v209_v38 = vld [vmem:[#allocation4 + $0xf0] sm:$0xff] }
  0x4c   :  { %v859_v36 = vpack.c.bf16 %v210_v34, %v208_v33  ;;  %v212_v39 = vld [vmem:[#allocation4 + $0x108] sm:$0xff]  ;;  %v214_v40 = vld [vmem:[#allocation4 + $0x118] sm:$0xff]  ;;  %v861_v41 = vpack.c.bf16 %v209_v38, %v207_v37  ;;  %v211_v43 = vld [vmem:[#allocation4 + $0x100] sm:$0xff] }
  0x4d   :  { %846 = vmatpush1.bf16.msra.mxu1 %v845_v11  ;;  %v863_v42 = vpack.c.bf16 %v214_v40, %v212_v39  ;;  %v213_v44 = vld [vmem:[#allocation4 + $0x110] sm:$0xff]  ;;  %v216_v45 = vld [vmem:[#allocation4 + $0x128] sm:$0xff]  ;;  %v218_v46 = vld [vmem:[#allocation4 + $0x138] sm:$0xff] }
  0x4e   :  { %822 = vmatpush1.bf16.msra.mxu0 %v821_v61  ;;  %848 = vmatprep.subr.bf16.mxu1 %v847_v14  ;;  %v865_v47 = vpack.c.bf16 %v213_v44, %v211_v43  ;;  %v867_v48 = vpack.c.bf16 %v218_v46, %v216_v45  ;;  %v215_v49 = vld [vmem:[#allocation4 + $0x120] sm:$0xff]  ;;  %v217_v50 = vld [vmem:[#allocation4 + $0x130] sm:$0xff]  ;;  %v220_v51 = vld [vmem:[#allocation4 + $0x148] sm:$0xff] }
  0x4f   :  { %824 = vmatprep.subr.bf16.mxu0 %v823_v5  ;;  %v222_v52 = vld [vmem:[#allocation4 + $0x158] sm:$0xff]  ;;  %v869_v53 = vpack.c.bf16 %v217_v50, %v215_v49  ;;  %v219_v55 = vld [vmem:[#allocation4 + $0x140] sm:$0xff]  ;;  %v221_v56 = vld [vmem:[#allocation4 + $0x150] sm:$0xff] }
  0x50   :  { %v871_v54 = vpack.c.bf16 %v222_v52, %v220_v51  ;;  %v224_v57 = vld [vmem:[#allocation4 + $0x168] sm:$0xff]  ;;  %v226_v58 = vld [vmem:[#allocation4 + $0x178] sm:$0xff]  ;;  %v873_v59 = vpack.c.bf16 %v221_v56, %v219_v55  ;;  %v223_v61 = vld [vmem:[#allocation4 + $0x160] sm:$0xff] }
  0x51   :  { %850 = vmatpush1.bf16.msra.mxu1 %v849_v21  ;;  %v875_v60 = vpack.c.bf16 %v226_v58, %v224_v57  ;;  %v225_v62 = vld [vmem:[#allocation4 + $0x170] sm:$0xff]  ;;  %v228_v63 = vld [vmem:[#allocation4 + $0x188] sm:$0xff]  ;;  %v230_v1 = vld [vmem:[#allocation4 + $0x198] sm:$0xff] }
  0x52   :  { %826 = vmatpush1.bf16.msra.mxu0 %v825_v12  ;;  %852 = vmatprep.subr.bf16.mxu1 %v851_v23  ;;  %v877_v4 = vpack.c.bf16 %v225_v62, %v223_v61  ;;  %v879_v5 = vpack.c.bf16 %v230_v1, %v228_v63  ;;  %v227_v6 = vld [vmem:[#allocation4 + $0x180] sm:$0xff]  ;;  %v229_v7 = vld [vmem:[#allocation4 + $0x190] sm:$0xff]  ;;  %v232_v8 = vld [vmem:[#allocation4 + $0x1a8] sm:$0xff] }
  0x53   :  { %828 = vmatprep.subr.bf16.mxu0 %v827_v17  ;;  %v234_v9 = vld [vmem:[#allocation4 + $0x1b8] sm:$0xff]  ;;  %v881_v10 = vpack.c.bf16 %v229_v7, %v227_v6  ;;  %v231_v12 = vld [vmem:[#allocation4 + $0x1a0] sm:$0xff]  ;;  %v233_v13 = vld [vmem:[#allocation4 + $0x1b0] sm:$0xff] }
  0x54   :  { %v883_v11 = vpack.c.bf16 %v234_v9, %v232_v8  ;;  %v236_v14 = vld [vmem:[#allocation4 + $0x1c8] sm:$0xff]  ;;  %v238_v15 = vld [vmem:[#allocation4 + $0x1d8] sm:$0xff]  ;;  %v885_v16 = vpack.c.bf16 %v233_v13, %v231_v12  ;;  %v235_v18 = vld [vmem:[#allocation4 + $0x1c0] sm:$0xff] }
  0x55   :  { %854 = vmatpush1.bf16.msra.mxu1 %v853_v28  ;;  %v887_v17 = vpack.c.bf16 %v238_v15, %v236_v14  ;;  %v237_v19 = vld [vmem:[#allocation4 + $0x1d0] sm:$0xff]  ;;  %v240_v21 = vld [vmem:[#allocation4 + $0x1e8] sm:$0xff]  ;;  %v239_v24 = vld [vmem:[#allocation4 + $0x1e0] sm:$0xff] }
  0x56   :  { %830 = vmatpush1.bf16.msra.mxu0 %v829_v22  ;;  %856 = vmatprep.subr.bf16.mxu1 %v855_v30  ;;  %v889_v20 = vpack.c.bf16 %v237_v19, %v235_v18  ;;  %v242_v22 = vld [vmem:[#allocation4 + $0x1f8] sm:$0xff]  ;;  %v241_v25 = vld [vmem:[#allocation4 + $0x1f0] sm:$0xff]  ;;  %v331_v27 = vld [vmem:[#allocation4 + $0x208] sm:$0xff] }
  0x57   :  { %v891_v23 = vpack.c.bf16 %v242_v22, %v240_v21  ;;  %v893_v26 = vpack.c.bf16 %v241_v25, %v239_v24  ;;  %v333_v28 = vld [vmem:[#allocation4 + $0x218] sm:$0xff]  ;;  %v330_v30 = vld [vmem:[#allocation4 + $0x200] sm:$0xff]  ;;  %v332_v32 = vld [vmem:[#allocation4 + $0x210] sm:$0xff] }
  0x58   :  { %v895_v31 = vpack.c.bf16 %v333_v28, %v331_v27  ;;  %v335_v33 = vld [vmem:[#allocation4 + $0x228] sm:$0xff]  ;;  %v337_v34 = vld [vmem:[#allocation4 + $0x238] sm:$0xff]  ;;  %v334_v37 = vld [vmem:[#allocation4 + $0x220] sm:$0xff] }
  0x59   :  { %171 = vmatmul.mubr.f32.vlgmr.msra.gmra.mrb[0].mxu0 %v1193_v29  ;;  %858 = vmatpush1.bf16.msra.mxu1 %v857_v35  ;;  %v897_v35 = vpack.c.bf16 %v332_v32, %v330_v30  ;;  %v336_v38 = vld [vmem:[#allocation4 + $0x230] sm:$0xff]  ;;  %v339_v39 = vld [vmem:[#allocation4 + $0x248] sm:$0xff]  ;;  %v341_v40 = vld [vmem:[#allocation4 + $0x258] sm:$0xff] }
  0x5a   :  { %860 = vmatprep.subr.bf16.mxu1 %v859_v36  ;;  %v899_v36 = vpack.c.bf16 %v337_v34, %v335_v33  ;;  %896 = vmatprep.subr.bf16.mxu0 %v895_v31  ;;  %v338_v43 = vld [vmem:[#allocation4 + $0x240] sm:$0xff]  ;;  %v340_v44 = vld [vmem:[#allocation4 + $0x250] sm:$0xff]  ;;  %v343_v45 = vld [vmem:[#allocation4 + $0x268] sm:$0xff] }
  0x5b   :  { %898 = vmatpush1.bf16.msra.mxu0 %v897_v35  ;;  %v345_v46 = vld [vmem:[#allocation4 + $0x278] sm:$0xff]  ;;  %v342_v49 = vld [vmem:[#allocation4 + $0x260] sm:$0xff]  ;;  %v344_v50 = vld [vmem:[#allocation4 + $0x270] sm:$0xff] }
  0x5c   :  { %900 = vmatprep.subr.bf16.mxu0 %v899_v36  ;;  %v347_v51 = vld [vmem:[#allocation4 + $0x288] sm:$0xff]  ;;  %v349_v52 = vld [vmem:[#allocation4 + $0x298] sm:$0xff]  ;;  %v346_v55 = vld [vmem:[#allocation4 + $0x280] sm:$0xff] }
  0x5d   :  { %862 = vmatpush1.bf16.msra.mxu1 %v861_v41  ;;  %v901_v41 = vpack.c.bf16 %v336_v38, %v334_v37  ;;  %v348_v56 = vld [vmem:[#allocation4 + $0x290] sm:$0xff]  ;;  %v351_v57 = vld [vmem:[#allocation4 + $0x2a8] sm:$0xff]  ;;  %v353_v58 = vld [vmem:[#allocation4 + $0x2b8] sm:$0xff] }
  0x5e   :  { %864 = vmatprep.subr.bf16.mxu1 %v863_v42  ;;  %v903_v42 = vpack.c.bf16 %v341_v40, %v339_v39  ;;  %v350_v61 = vld [vmem:[#allocation4 + $0x2a0] sm:$0xff]  ;;  %v352_v62 = vld [vmem:[#allocation4 + $0x2b0] sm:$0xff]  ;;  %v355_v63 = vld [vmem:[#allocation4 + $0x2c8] sm:$0xff] }
  0x5f   :  { %902 = vmatpush1.bf16.msra.mxu0 %v901_v41  ;;  %v357_v1 = vld [vmem:[#allocation4 + $0x2d8] sm:$0xff]  ;;  %v354_v6 = vld [vmem:[#allocation4 + $0x2c0] sm:$0xff]  ;;  %v356_v7 = vld [vmem:[#allocation4 + $0x2d0] sm:$0xff] }
  0x60   :  { %904 = vmatprep.subr.bf16.mxu0 %v903_v42  ;;  %v359_v8 = vld [vmem:[#allocation4 + $0x2e8] sm:$0xff]  ;;  %v361_v9 = vld [vmem:[#allocation4 + $0x2f8] sm:$0xff]  ;;  %v358_v12 = vld [vmem:[#allocation4 + $0x2e0] sm:$0xff] }
  0x61   :  { %866 = vmatpush1.bf16.msra.mxu1 %v865_v47  ;;  %v905_v47 = vpack.c.bf16 %v340_v44, %v338_v43  ;;  %v360_v13 = vld [vmem:[#allocation4 + $0x2f0] sm:$0xff]  ;;  %v363_v14 = vld [vmem:[#allocation4 + $0x308] sm:$0xff]  ;;  %v365_v15 = vld [vmem:[#allocation4 + $0x318] sm:$0xff] }
  0x62   :  { %868 = vmatprep.subr.bf16.mxu1 %v867_v48  ;;  %v907_v48 = vpack.c.bf16 %v345_v46, %v343_v45  ;;  %v362_v18 = vld [vmem:[#allocation4 + $0x300] sm:$0xff]  ;;  %v364_v19 = vld [vmem:[#allocation4 + $0x310] sm:$0xff]  ;;  %v369_v21 = vld [vmem:[#allocation4 + $0x338] sm:$0xff] }
  0x63   :  { %906 = vmatpush1.bf16.msra.mxu0 %v905_v47  ;;  %v929_v22 = vpack.c.bf16 %v364_v19, %v362_v18  ;;  %v366_v24 = vld [vmem:[#allocation4 + $0x320] sm:$0xff]  ;;  %v368_v25 = vld [vmem:[#allocation4 + $0x330] sm:$0xff]  ;;  %v373_v27 = vld [vmem:[#allocation4 + $0x358] sm:$0xff] }
  0x64   :  { %908 = vmatprep.subr.bf16.mxu0 %v907_v48  ;;  %v933_v28 = vpack.c.bf16 %v368_v25, %v366_v24  ;;  %v370_v31 = vld [vmem:[#allocation4 + $0x340] sm:$0xff]  ;;  %v372_v32 = vld [vmem:[#allocation4 + $0x350] sm:$0xff]  ;;  %v375_v33 = vld [vmem:[#allocation4 + $0x368] sm:$0xff] }
  0x65   :  { %870 = vmatpush1.bf16.msra.mxu1 %v869_v53  ;;  %v909_v53 = vpack.c.bf16 %v344_v50, %v342_v49  ;;  %v377_v34 = vld [vmem:[#allocation4 + $0x378] sm:$0xff]  ;;  %v937_v35 = vpack.c.bf16 %v372_v32, %v370_v31  ;;  %v374_v37 = vld [vmem:[#allocation4 + $0x360] sm:$0xff]  ;;  %v376_v38 = vld [vmem:[#allocation4 + $0x370] sm:$0xff] }
  0x66   :  { %872 = vmatprep.subr.bf16.mxu1 %v871_v54  ;;  %v911_v54 = vpack.c.bf16 %v349_v52, %v347_v51  ;;  %v939_v36 = vpack.c.bf16 %v377_v34, %v375_v33  ;;  %v379_v39 = vld [vmem:[#allocation4 + $0x388] sm:$0xff]  ;;  %v381_v40 = vld [vmem:[#allocation4 + $0x398] sm:$0xff]  ;;  %v941_v41 = vpack.c.bf16 %v376_v38, %v374_v37  ;;  %v378_v43 = vld [vmem:[#allocation4 + $0x380] sm:$0xff] }
  0x67   :  { %910 = vmatpush1.bf16.msra.mxu0 %v909_v53  ;;  %v943_v42 = vpack.c.bf16 %v381_v40, %v379_v39  ;;  %v380_v44 = vld [vmem:[#allocation4 + $0x390] sm:$0xff]  ;;  %v383_v45 = vld [vmem:[#allocation4 + $0x3a8] sm:$0xff]  ;;  %v385_v46 = vld [vmem:[#allocation4 + $0x3b8] sm:$0xff] }
  0x68   :  { %912 = vmatprep.subr.bf16.mxu0 %v911_v54  ;;  %v945_v47 = vpack.c.bf16 %v380_v44, %v378_v43  ;;  %v947_v48 = vpack.c.bf16 %v385_v46, %v383_v45  ;;  %v382_v49 = vld [vmem:[#allocation4 + $0x3a0] sm:$0xff]  ;;  %v384_v50 = vld [vmem:[#allocation4 + $0x3b0] sm:$0xff]  ;;  %v387_v51 = vld [vmem:[#allocation4 + $0x3c8] sm:$0xff] }
  0x69   :  { %874 = vmatpush1.bf16.msra.mxu1 %v873_v59  ;;  %v913_v59 = vpack.c.bf16 %v348_v56, %v346_v55  ;;  %v389_v52 = vld [vmem:[#allocation4 + $0x3d8] sm:$0xff]  ;;  %v949_v53 = vpack.c.bf16 %v384_v50, %v382_v49  ;;  %v97_v55 = vshrl.u32 %v96_v0, 7  ;;  %v386_v0 = vld [vmem:[#allocation4 + $0x3c0] sm:$0xff]  ;;  %v608_v18 = vld [vmem:[#allocation6 + $0x188] sm:$0xff] }
  0x6a   :  { %876 = vmatprep.subr.bf16.mxu1 %v875_v60  ;;  %v915_v60 = vpack.c.bf16 %v353_v58, %v351_v57  ;;  %v951_v54 = vpack.c.bf16 %v389_v52, %v387_v51  ;;  %v94_v57 = vld [vmem:[%s1234_s4] sm:$0x3]  ;;  %v499_v24 = vld [vmem:[#allocation6 + $0x98] sm:$0xff]  ;;  %v501_v31 = vld [vmem:[#allocation6 + $0xa8] sm:$0xff] }
  0x6b   :  { %914 = vmatpush1.bf16.msra.mxu0 %v913_v59  ;;  %v1197_v56 = vsub.s32 0, %v97_v55  ;;  %v1202_v58 = vsub.s32 1, %v97_v55  ;;  %v480_v19 = vld [vmem:[#allocation6] sm:$0xff]  ;;  %v485_v34 = vld [vmem:[#allocation6 + $0x28] sm:$0xff]  ;;  %v503_v37 = vld [vmem:[#allocation6 + $0xb8] sm:$0xff] }
  0x6c   :  { %916 = vmatprep.subr.bf16.mxu0 %v915_v60  ;;  %v484_v33 = vld [vmem:[#allocation6 + $0x20] sm:$0xff]  ;;  %v486_v39 = vld [vmem:[#allocation6 + $0x30] sm:$0xff]  ;;  %v487_v40 = vld [vmem:[#allocation6 + $0x38] sm:$0xff] }
  0x6d   :  { %878 = vmatpush1.bf16.msra.mxu1 %v877_v4  ;;  %v917_v4 = vpack.c.bf16 %v352_v62, %v350_v61  ;;  %v99_v59 = vrot.slane %v94_v57, %v1197_v56  ;;  %v103_v60 = vrot.slane %v94_v57, %v1202_v58  ;;  %v505_v43 = vld [vmem:[#allocation6 + $0xc8] sm:$0xff]  ;;  %v488_v45 = vld [vmem:[#allocation6 + $0x40] sm:$0xff]  ;;  %v507_v49 = vld [vmem:[#allocation6 + $0xd8] sm:$0xff] }
  0x6e   :  { %880 = vmatprep.subr.bf16.mxu1 %v879_v5  ;;  %v919_v5 = vpack.c.bf16 %v357_v1, %v355_v63  ;;  %v489_v46 = vld [vmem:[#allocation6 + $0x48] sm:$0xff]  ;;  %v490_v51 = vld [vmem:[#allocation6 + $0x50] sm:$0xff]  ;;  %v491_v52 = vld [vmem:[#allocation6 + $0x58] sm:$0xff] }
  0x6f   :  { %918 = vmatpush1.bf16.msra.mxu0 %v917_v4  ;;  %v509_v55 = vld [vmem:[#allocation6 + $0xe8] sm:$0xff] }
  0x70   :  { %920 = vmatprep.subr.bf16.mxu0 %v919_v5 }
  0x71   :  { %882 = vmatpush1.bf16.msra.mxu1 %v881_v10  ;;  %v921_v10 = vpack.c.bf16 %v356_v7, %v354_v6  ;;  %v388_v6 = vld [vmem:[#allocation4 + $0x3d0] sm:$0xff] }
  0x72   :  { %884 = vmatprep.subr.bf16.mxu1 %v883_v11  ;;  %v923_v11 = vpack.c.bf16 %v361_v9, %v359_v8  ;;  %v953_v7 = vpack.c.bf16 %v388_v6, %v386_v0  ;;  %v391_v8 = vld [vmem:[#allocation4 + $0x3e8] sm:$0xff]  ;;  %v393_v9 = vld [vmem:[#allocation4 + $0x3f8] sm:$0xff]  ;;  %v609_v6 = vld [vmem:[#allocation6 + $0x190] sm:$0xff] }
  0x73   :  { %922 = vmatpush1.bf16.msra.mxu0 %v921_v10  ;;  %v955_v10 = vpack.c.bf16 %v393_v9, %v391_v8 }
  0x74   :  { %924 = vmatprep.subr.bf16.mxu0 %v923_v11  ;;  %v390_v11 = vld [vmem:[#allocation4 + $0x3e0] sm:$0xff] }
  0x75   :  { %886 = vmatpush1.bf16.msra.mxu1 %v885_v16  ;;  %v925_v16 = vpack.c.bf16 %v360_v13, %v358_v12  ;;  %v392_v12 = vld [vmem:[#allocation4 + $0x3f0] sm:$0xff] }
  0x76   :  { %888 = vmatprep.subr.bf16.mxu1 %v887_v17  ;;  %v927_v17 = vpack.c.bf16 %v365_v15, %v363_v14  ;;  %v957_v13 = vpack.c.bf16 %v392_v12, %v390_v11  ;;  %v496_v14 = vld [vmem:[#allocation6 + $0x80] sm:$0xff]  ;;  %v497_v15 = vld [vmem:[#allocation6 + $0x88] sm:$0xff]  ;;  %v593_v12 = vld [vmem:[#allocation6 + $0x110] sm:$0xff] }
  0x77   :  { %926 = vmatpush1.bf16.msra.mxu0 %v925_v16  ;;  %v607_v16 = vld [vmem:[#allocation6 + $0x180] sm:$0xff] }
  0x78   :  { %928 = vmatprep.subr.bf16.mxu0 %v927_v17  ;;  %v959_v17 = vpack.c.bf16 %v497_v15, %v496_v14  ;;  %v611_v14 = vld [vmem:[#allocation6 + $0x1a0] sm:$0xff]  ;;  %v612_v15 = vld [vmem:[#allocation6 + $0x1a8] sm:$0xff] }
  0x79   :  { %890 = vmatpush1.bf16.msra.mxu1 %v889_v20  ;;  %v367_v20 = vld [vmem:[#allocation4 + $0x328] sm:$0xff] }
  0x7a   :  { %892 = vmatprep.subr.bf16.mxu1 %v891_v23  ;;  %v931_v23 = vpack.c.bf16 %v369_v21, %v367_v20  ;;  %v481_v20 = vld [vmem:[#allocation6 + $0x8] sm:$0xff]  ;;  %v991_v21 = vpack.c.bf16 %v608_v18, %v607_v16  ;;  %v595_v18 = vld [vmem:[#allocation6 + $0x120] sm:$0xff] }
  0x7b   :  { %930 = vmatpush1.bf16.msra.mxu0 %v929_v22  ;;  %v961_v22 = vpack.c.bf16 %v481_v20, %v480_v19  ;;  %v596_v19 = vld [vmem:[#allocation6 + $0x128] sm:$0xff]  ;;  %v613_v20 = vld [vmem:[#allocation6 + $0x1b0] sm:$0xff] }
  0x7c   :  { %932 = vmatprep.subr.bf16.mxu0 %v931_v23  ;;  %v498_v23 = vld [vmem:[#allocation6 + $0x90] sm:$0xff] }
  0x7d   :  { %894 = vmatpush1.bf16.msra.mxu1 %v893_v26  ;;  %v371_v26 = vld [vmem:[#allocation4 + $0x348] sm:$0xff]  ;;  %v963_v25 = vpack.c.bf16 %v499_v24, %v498_v23  ;;  %v597_v24 = vld [vmem:[#allocation6 + $0x130] sm:$0xff] }
  0x7e   :  { %v935_v30 = vpack.c.bf16 %v373_v27, %v371_v26  ;;  %960 = vmatprep.subr.bf16.mxu1 %v959_v17  ;;  %v482_v26 = vld [vmem:[#allocation6 + $0x10] sm:$0xff]  ;;  %v483_v27 = vld [vmem:[#allocation6 + $0x18] sm:$0xff]  ;;  %v999_v17 = vpack.c.bf16 %v612_v15, %v611_v14 }
  0x7f   :  { %934 = vmatpush1.bf16.msra.mxu0 %v933_v28  ;;  %v965_v28 = vpack.c.bf16 %v483_v27, %v482_v26  ;;  %v615_v26 = vld [vmem:[#allocation6 + $0x1c0] sm:$0xff]  ;;  %v616_v27 = vld [vmem:[#allocation6 + $0x1c8] sm:$0xff] }
  0x80   :  { %936 = vmatprep.subr.bf16.mxu0 %v935_v30  ;;  %v500_v30 = vld [vmem:[#allocation6 + $0xa0] sm:$0xff] }
  0x81   :  { %v967_v32 = vpack.c.bf16 %v501_v31, %v500_v30  ;;  %v1007_v30 = vpack.c.bf16 %v616_v27, %v615_v26  ;;  %v599_v31 = vld [vmem:[#allocation6 + $0x140] sm:$0xff] }
  0x83   :  { %938 = vmatpush1.bf16.msra.mxu0 %v937_v35  ;;  %v969_v35 = vpack.c.bf16 %v485_v34, %v484_v33  ;;  %v617_v33 = vld [vmem:[#allocation6 + $0x1d0] sm:$0xff]  ;;  %v618_v34 = vld [vmem:[#allocation6 + $0x1d8] sm:$0xff] }
  0x84   :  { %940 = vmatprep.subr.bf16.mxu0 %v939_v36  ;;  %v502_v36 = vld [vmem:[#allocation6 + $0xb0] sm:$0xff] }
  0x85   :  { %v971_v38 = vpack.c.bf16 %v503_v37, %v502_v36  ;;  %v1011_v36 = vpack.c.bf16 %v618_v34, %v617_v33  ;;  %v601_v37 = vld [vmem:[#allocation6 + $0x150] sm:$0xff] }
  0x87   :  { %942 = vmatpush1.bf16.msra.mxu0 %v941_v41  ;;  %v973_v41 = vpack.c.bf16 %v487_v40, %v486_v39  ;;  %v619_v39 = vld [vmem:[#allocation6 + $0x1e0] sm:$0xff]  ;;  %v620_v40 = vld [vmem:[#allocation6 + $0x1e8] sm:$0xff] }
  0x88   :  { %944 = vmatprep.subr.bf16.mxu0 %v943_v42  ;;  %v504_v42 = vld [vmem:[#allocation6 + $0xc0] sm:$0xff] }
  0x89   :  { %v975_v44 = vpack.c.bf16 %v505_v43, %v504_v42  ;;  %v1015_v42 = vpack.c.bf16 %v620_v40, %v619_v39  ;;  %v492_v43 = vld [vmem:[#allocation6 + $0x60] sm:$0xff] }
  0x8b   :  { %946 = vmatpush1.bf16.msra.mxu0 %v945_v47  ;;  %v977_v47 = vpack.c.bf16 %v489_v46, %v488_v45  ;;  %v603_v45 = vld [vmem:[#allocation6 + $0x160] sm:$0xff] }
  0x8c   :  { %948 = vmatprep.subr.bf16.mxu0 %v947_v48  ;;  %v506_v48 = vld [vmem:[#allocation6 + $0xd0] sm:$0xff] }
  0x8d   :  { %v979_v50 = vpack.c.bf16 %v507_v49, %v506_v48  ;;  %v510_v49 = vld [vmem:[#allocation6 + $0xf0] sm:$0xff] }
  0x8f   :  { %950 = vmatpush1.bf16.msra.mxu0 %v949_v53  ;;  %v981_v53 = vpack.c.bf16 %v491_v52, %v490_v51  ;;  %v621_v51 = vld [vmem:[#allocation6 + $0x1f0] sm:$0xff] }
  0x90   :  { %952 = vmatprep.subr.bf16.mxu0 %v951_v54  ;;  %v508_v54 = vld [vmem:[#allocation6 + $0xe0] sm:$0xff] }
  0x91   :  { %v983_v57 = vpack.c.bf16 %v509_v55, %v508_v54  ;;  %v494_v54 = vld [vmem:[#allocation6 + $0x70] sm:$0xff]  ;;  %v495_v55 = vld [vmem:[#allocation6 + $0x78] sm:$0xff] }
  0x93   :  { %954 = vmatpush1.bf16.msra.mxu0 %v953_v7  ;;  %v610_v7 = vld [vmem:[#allocation6 + $0x198] sm:$0xff] }
  0x94   :  { %956 = vmatprep.subr.bf16.mxu0 %v955_v10  ;;  %v995_v11 = vpack.c.bf16 %v610_v7, %v609_v6 }
  0x97   :  { %958 = vmatpush1.bf16.msra.mxu0 %v957_v13  ;;  %v594_v13 = vld [vmem:[#allocation6 + $0x118] sm:$0xff] }
  0x98   :  { %992 = vmatprep.subr.bf16.mxu0 %v991_v21  ;;  %v997_v16 = vpack.c.bf16 %v594_v13, %v593_v12  ;;  %v614_v21 = vld [vmem:[#allocation6 + $0x1b8] sm:$0xff] }
  0x99   :  { %v1003_v23 = vpack.c.bf16 %v614_v21, %v613_v20  ;;  %v727_v20 = vld [vmem:[%s1234_s4 + $0x8] sm:$0x3] }
  0x9a   :  { %v629_v21 = vrot.slane %v727_v20, %v1197_v56 }
 0x12c   :  { %v172_v61 = vpop.f32.mrb[0].mxu0 }
 0x12d   :  { %v173_v62 = vadd.f32 %v172_v61, %v99_v59  ;;  %v174_v63 = vpop.f32.mrb[1].mxu0  ;;  %v724_v59 = vld [vmem:[%s1234_s4 + $0x2] sm:$0x3] }
 0x12e   :  { %v175_v1 = vadd.f32 %v174_v63, %v103_v60  ;;  %v249_v60 = vrot.slane %v724_v59, %v1197_v56  ;;  %v253_v61 = vrot.slane %v724_v59, %v1202_v58  ;;  %v989_v59 = vpack.c.bf16 %v495_v55, %v494_v54 }
 0x12f   :  { %v177_v5 = vmax.f32 %v173_v62, 0.0 }
 0x130   :  { %v178_v4 = vmax.f32 %v175_v1, 0.0 }
 0x132   :  { %320 = vmatprep.mubr.f32.mxu1 %v178_v4  ;;  %v591_v4 = vld [vmem:[#allocation6 + $0x100] sm:$0xff] }
 0x133   :  { %321 = vmatmul.mubr.f32.vlgmr.msra.gmra.mrb[0].mxu1 %v177_v5  ;;  %v592_v5 = vld [vmem:[#allocation6 + $0x108] sm:$0xff] }
 0x134   :  { %962 = vmatpush3.bf16.msra.mxu1 %v961_v22  ;;  %v993_v9 = vpack.c.bf16 %v592_v5, %v591_v4  ;;  %v1001_v22 = vpack.c.bf16 %v596_v19, %v595_v18 }
 0x135   :  { %964 = vmatprep.subr.bf16.mxu1 %v963_v25  ;;  %v598_v25 = vld [vmem:[#allocation6 + $0x138] sm:$0xff] }
 0x138   :  { %966 = vmatpush3.bf16.msra.mxu1 %v965_v28  ;;  %v1005_v28 = vpack.c.bf16 %v598_v25, %v597_v24 }
 0x139   :  { %968 = vmatprep.subr.bf16.mxu1 %v967_v32  ;;  %v600_v32 = vld [vmem:[#allocation6 + $0x148] sm:$0xff] }
 0x13c   :  { %970 = vmatpush3.bf16.msra.mxu1 %v969_v35  ;;  %v1009_v35 = vpack.c.bf16 %v600_v32, %v599_v31 }
 0x13d   :  { %972 = vmatprep.subr.bf16.mxu1 %v971_v38  ;;  %v602_v38 = vld [vmem:[#allocation6 + $0x158] sm:$0xff] }
 0x140   :  { %974 = vmatpush3.bf16.msra.mxu1 %v973_v41  ;;  %v1013_v41 = vpack.c.bf16 %v602_v38, %v601_v37 }
 0x141   :  { %976 = vmatprep.subr.bf16.mxu1 %v975_v44  ;;  %v493_v44 = vld [vmem:[#allocation6 + $0x68] sm:$0xff] }
 0x142   :  { %v985_v46 = vpack.c.bf16 %v493_v44, %v492_v43 }
 0x144   :  { %978 = vmatpush3.bf16.msra.mxu1 %v977_v47  ;;  %v604_v47 = vld [vmem:[#allocation6 + $0x168] sm:$0xff] }
 0x145   :  { %980 = vmatprep.subr.bf16.mxu1 %v979_v50  ;;  %v1017_v48 = vpack.c.bf16 %v604_v47, %v603_v45  ;;  %v511_v50 = vld [vmem:[#allocation6 + $0xf8] sm:$0xff] }
 0x146   :  { %v987_v52 = vpack.c.bf16 %v511_v50, %v510_v49 }
 0x148   :  { %982 = vmatpush3.bf16.msra.mxu1 %v981_v53  ;;  %v622_v53 = vld [vmem:[#allocation6 + $0x1f8] sm:$0xff] }
 0x149   :  { %984 = vmatprep.subr.bf16.mxu1 %v983_v57  ;;  %v1019_v57 = vpack.c.bf16 %v622_v53, %v621_v51 }
 0x14c   :  { %986 = vmatpush3.bf16.msra.mxu1 %v985_v46 }
 0x14d   :  { %988 = vmatprep.subr.bf16.mxu1 %v987_v52 }
 0x150   :  { %990 = vmatpush3.bf16.msra.mxu1 %v989_v59 }
 0x206   :  { %v322_v62 = vpop.f32.mrb[0].mxu1 }
 0x207   :  { %v323_v63 = vadd.f32 %v322_v62, %v249_v60  ;;  %v324_v1 = vpop.f32.mrb[1].mxu1  ;;  %v605_v60 = vld [vmem:[#allocation6 + $0x170] sm:$0xff] }
 0x208   :  { %v325_v0 = vadd.f32 %v324_v1, %v253_v61  ;;  %v606_v61 = vld [vmem:[#allocation6 + $0x178] sm:$0xff] }
 0x209   :  { %v327_v10 = vmax.f32 %v323_v63, 0.0  ;;  %v1021_v62 = vpack.c.bf16 %v606_v61, %v605_v60  ;;  %v725_v63 = vld [vmem:[%s1234_s4 + $0x4] sm:$0x3] }
 0x20a   :  { %v328_v8 = vmax.f32 %v325_v0, 0.0  ;;  %v400_v1 = vrot.slane %v725_v63, %v1197_v56  ;;  %v404_v4 = vrot.slane %v725_v63, %v1202_v58 }
 0x20c   :  { %471 = vmatprep.mubr.f32.mxu0 %v328_v8 }
 0x20d   :  { %472 = vmatmul.mubr.f32.vlgmr.msra.gmra.mrb[2].mxu0 %v327_v10  ;;  %v726_v10 = vld [vmem:[%s1234_s4 + $0x6] sm:$0x3] }
 0x20e   :  { %994 = vmatpush3.bf16.msra.mxu0 %v993_v9  ;;  %v518_v13 = vrot.slane %v726_v10, %v1197_v56 }
 0x20f   :  { %996 = vmatprep.subr.bf16.mxu0 %v995_v11 }
 0x212   :  { %998 = vmatpush3.bf16.msra.mxu0 %v997_v16 }
 0x213   :  { %1000 = vmatprep.subr.bf16.mxu0 %v999_v17 }
 0x216   :  { %1002 = vmatpush3.bf16.msra.mxu0 %v1001_v22 }
 0x217   :  { %1004 = vmatprep.subr.bf16.mxu0 %v1003_v23 }
 0x21a   :  { %1006 = vmatpush3.bf16.msra.mxu0 %v1005_v28 }
 0x21b   :  { %1008 = vmatprep.subr.bf16.mxu0 %v1007_v30 }
 0x21e   :  { %1010 = vmatpush3.bf16.msra.mxu0 %v1009_v35 }
 0x21f   :  { %1012 = vmatprep.subr.bf16.mxu0 %v1011_v36 }
 0x222   :  { %1014 = vmatpush3.bf16.msra.mxu0 %v1013_v41 }
 0x223   :  { %1016 = vmatprep.subr.bf16.mxu0 %v1015_v42 }
 0x226   :  { %1018 = vmatpush3.bf16.msra.mxu0 %v1017_v48 }
 0x227   :  { %1020 = vmatprep.subr.bf16.mxu0 %v1019_v57 }
 0x22a   :  { %1022 = vmatpush3.bf16.msra.mxu0 %v1021_v62 }
 0x2e0   :  { %v473_v5 = vpop.f32.mrb[2].mxu0 }
 0x2e1   :  { %v474_v0 = vadd.f32 %v473_v5, %v400_v1  ;;  %v475_v6 = vpop.f32.mrb[3].mxu0 }
 0x2e2   :  { %v476_v7 = vadd.f32 %v475_v6, %v404_v4 }
 0x2e3   :  { %v478_v9 = vmax.f32 %v474_v0, 0.0 }
 0x2e4   :  { %v479_v8 = vmax.f32 %v476_v7, 0.0 }
 0x2e6   :  { %584 = vmatprep.mubr.f32.mxu1 %v479_v8  ;;  %695 = vmatprep.mubr.f32.mxu0 %v479_v8 }
 0x2e7   :  { %585 = vmatmul.mubr.f32.vlgmr.msra.gmra.mrb[2].mxu1 %v478_v9  ;;  %696 = vmatmul.mubr.f32.vlgmr.msra.gmra.mrb[4].mxu0 %v478_v9 }
 0x3ba   :  { %v761_v11 = vpop.f32.mrb[2].mxu1  ;;  %v796_v12 = vpop.f32.mrb[4].mxu0 }
 0x3bb   :  { %v762_v14 = vpop.f32.mrb[3].mxu1  ;;  %v797_v58 = vpop.f32.mrb[5].mxu0 }
 0x3bc   :  { %v763_v15 = vadd.f32 %v762_v14, %v761_v11  ;;  %v798_v16 = vadd.f32 %v797_v58, %v796_v12 }
 0x3be   :  { %v587_v17 = vadd.f32 %v763_v15, %v518_v13  ;;  %v698_v23 = vadd.f32 %v798_v16, %v629_v21 }
 0x3c0   :  { %v706_v18 = vmul.f32 %v1188_v3, %v587_v17  ;;  %711 = vadd.xlane.f32.xlu0 %v587_v17 }
 0x3c2   :  { %v707_v19 = vmul.f32 1.442695, %v706_v18 }
 0x3c4   :  { %1031 = vpow2.f32 %v707_v19 }
 0x3ce   :  { %v1032_v22 = vpop.eup %1031 }
 0x3cf   :  { %v709_v24 = vmul.f32 %v1032_v22, %v1193_v29 }
 0x3d1   :  { %v710_v25 = vadd.f32 %v709_v24, %v698_v23 }
 0x44d   :  { %v712_v26 = vpop.xlane.xlu0 %711 }
 0x44e   :  { %v716_v27 = vsel %vm713_vm1, %v712_v26, %v710_v25 }
 0x44f   :  { %717 = vst [vmem:[%s1235_s5] sm:$0xff] %v716_v27 }
 0x450   :  { %722 = vsyncpa [#allocation3], 1 }
 0x451   :  { %723 = vsyncpa [#allocation5], 1 }

</bundles_post_ra>
